<compile_context>
chip_gen: v6e
topology: v6e:2x2x1
jax: 0.10.0
libtpu: 0.0.40
codegen_flags: <defaults>
</compile_context>

<pallas_src>
import functools

import jax
import jax.numpy as jnp
from jax.experimental import pallas as pl
from jax.experimental.pallas import tpu as pltpu


def _round_up(x, m):
    return (x + m - 1) // m * m


# ------------------------------- fused kernel --------------------------------

def _fused_kernel(x_ref, we_ref, be_ref, wd_ref, bd_ref,
                  z_ref, y_ref, sse_ref, *, m_total, need_mask):
    """Fused encode -> decode -> raw-SSE partial for one feature-major row tile.

    x_ref  : (K, tm)      raw image values in [0, 1]   (K = C*r*r, lane-dense)
    we_ref : (C_lat, K)   folded encoder weight  (2 * conv weight)
    be_ref : (C_lat, 1)   folded encoder bias   (f32)
    wd_ref : (K, C_lat)   folded decoder weight (0.5 * deconv weight, f32)
    bd_ref : (K, 1)       folded decoder bias   (f32)
    z_ref  : (C_lat, tm)  latent ("hidden") tile
    y_ref  : (K, tm)      reconstruction tile, already mapped back to [0, 1]
    sse_ref: (1, 1, 1)    this tile's raw sum of squared errors (f32)
    """
    i = pl.program_id(0)
    tm = x_ref.shape[1]

    x = x_ref[...]                                   # stream dtype, raw values

    # _encode (x*2-1 folded into we/be): (C_lat,K) @ (K,tm) on the MXU.
    z = jnp.dot(we_ref[...], x, preferred_element_type=jnp.float32) + be_ref[...]
    z_ref[...] = z.astype(z_ref.dtype)

    # _decode ((y+1)/2 folded into wd/bd): (K,C_lat) @ (C_lat,tm), consuming z
    # straight from VMEM.
    recon = jnp.dot(wd_ref[...], z, preferred_element_type=jnp.float32) + bd_ref[...]
    y_ref[...] = recon.astype(y_ref.dtype)

    # forward_loss partial: raw SSE for this tile, computed in f32.
    d = recon - x.astype(jnp.float32)
    sq = d * d
    if need_mask:                                    # static: only when M was padded
        col = i * tm + jax.lax.broadcasted_iota(jnp.int32, (1, tm), 1)
        sq = jnp.where(col < m_total, sq, 0.0)

    tot = jnp.sum(sq, axis=1, keepdims=True).sum(axis=0, keepdims=True)  # (1,1)
    sse_ref[...] = tot.reshape(1, 1, 1)


# ------------------------------ params / wrapper ------------------------------

def init_params(key, num_channel=3, num_latent_channel=4, compress_ratio=4):
    """Weights stored in the kernel's feature-major layout (f32 masters).

    w_enc_t == Conv2d(C, C_lat, r, stride=r).weight reshaped to (C_lat, C*r*r)
    w_dec_t == ConvTranspose2d(C_lat, C, r, stride=r).weight reshaped to (C*r*r, C_lat)
    """
    r = compress_ratio
    K = num_channel * r * r
    k1, k2 = jax.random.split(key)
    w_enc_t = jax.random.normal(k1, (num_latent_channel, K), jnp.float32) / jnp.sqrt(K)
    b_enc = jnp.zeros((num_latent_channel, 1), jnp.float32)
    w_dec_t = (jax.random.normal(k2, (K, num_latent_channel), jnp.float32)
               / jnp.sqrt(num_latent_channel))
    b_dec = jnp.zeros((K, 1), jnp.float32)
    return dict(w_enc_t=w_enc_t, b_enc=b_enc, w_dec_t=w_dec_t, b_dec=b_dec)


def compressor_forward(x, params, *, patch_len, compress_ratio,
                       tm_max=8192, stream_dtype=jnp.bfloat16):
    """x: (B, C, H, W) image values in [0, 1].

    Returns (recon, hidden, loss); recon/hidden are in `stream_dtype`.
    """
    r = compress_ratio
    B, C, H, W = x.shape
    assert H % r == 0 and W % r == 0
    # patchify/unpatchify commute with the per-column compressor (patch width
    # patch_len*H is a multiple of r), so the round trip is an exact identity.
    assert (patch_len * H) % r == 0

    K = C * r * r
    C_lat = params["w_enc_t"].shape[0]
    M = B * (H // r) * (W // r)

    # Fold the affine pre/post scales into the weights (exact in f32):
    #   z = W_e (2x-1) + b_e  == (2 W_e) x + (b_e - sum_k W_e)
    #   recon = (W_d z + b_d + 1)/2 == (0.5 W_d) z + 0.5 (b_d + 1)
    w_enc_f = (params["w_enc_t"] * 2.0).astype(stream_dtype)
    b_enc_f = (params["b_enc"]
               - jnp.sum(params["w_enc_t"], axis=1, keepdims=True)).astype(jnp.float32)
    w_dec_f = (params["w_dec_t"] * 0.5).astype(jnp.float32)
    b_dec_f = ((params["b_dec"] + 1.0) * 0.5).astype(jnp.float32)

    # Space-to-depth, feature-major: (K, M), columns ordered (b, h/r, w/r).
    # Done in the streaming dtype so this layout pass moves half the bytes in bf16.
    # TODO(synk): fuse this producer into the input DMA (allow_input_fusion) or
    # read raw NCHW blocks in-kernel to remove the extra HBM pass entirely.
    xt = x.astype(stream_dtype).reshape(B, C, H // r, r, W // r, r)
    xt = jnp.transpose(xt, (1, 3, 5, 0, 2, 4)).reshape(K, M)

    tm_max = max(128, (tm_max // 128) * 128)
    tm = min(tm_max, _round_up(M, 128))
    M_pad = _round_up(M, tm)
    if M_pad != M:
        xt = jnp.pad(xt, ((0, 0), (0, M_pad - M)))
    num_tiles = M_pad // tm

    kernel = functools.partial(_fused_kernel, m_total=M, need_mask=(M_pad != M))

    itemsize = jnp.dtype(stream_dtype).itemsize
    cost = pl.CostEstimate(
        flops=int(4 * K * C_lat * M_pad + 4 * K * M_pad),
        transcendentals=0,
        bytes_accessed=int(itemsize * (2 * K + C_lat) * M_pad
                           + 4 * (2 * K * C_lat + K + C_lat + num_tiles)),
    )

    z_t, y_t, sse = pl.pallas_call(
        kernel,
        out_shape=(
            jax.ShapeDtypeStruct((C_lat, M_pad), stream_dtype),    # latent (hidden)
            jax.ShapeDtypeStruct((K, M_pad), stream_dtype),        # recon, matmul layout
            jax.ShapeDtypeStruct((num_tiles, 1, 1), jnp.float32),  # per-tile raw SSE
        ),
        grid=(num_tiles,),
        in_specs=[
            pl.BlockSpec((K, tm), lambda i: (0, i)),               # x tile (lane-dense)
            pl.BlockSpec((C_lat, K), lambda i: (0, 0)),            # encoder weight
            pl.BlockSpec((C_lat, 1), lambda i: (0, 0)),            # encoder bias
            pl.BlockSpec((K, C_lat), lambda i: (0, 0)),            # decoder weight
            pl.BlockSpec((K, 1), lambda i: (0, 0)),                # decoder bias
        ],
        out_specs=(
            pl.BlockSpec((C_lat, tm), lambda i: (0, i)),
            pl.BlockSpec((K, tm), lambda i: (0, i)),
            pl.BlockSpec((1, 1, 1), lambda i: (i, 0, 0)),          # per-tile partial
        ),
        # Every output block is tile-private, so the axis can be parallel
        # (sharded across both TensorCores on v7x).
        compiler_params=pltpu.CompilerParams(
            dimension_semantics=("parallel",)),
        cost_estimate=cost,
    )(xt, w_enc_f, b_enc_f, w_dec_f, b_dec_f)

    z_t = z_t[:, :M]
    y_t = y_t[:, :M]

    # hidden: (C_lat, b, h/r, w/r) -> NCHW
    hidden = z_t.reshape(C_lat, B, H // r, W // r).transpose(1, 0, 2, 3)
    # recon: depth-to-space inverse of the input transform -> NCHW
    recon = y_t.reshape(C, r, r, B, H // r, W // r)
    recon = jnp.transpose(recon, (3, 0, 4, 1, 5, 2)).reshape(B, C, H, W)
    # forward_loss: normalize the raw SSE once (mean over B*C*H*W elements).
    loss = jnp.sum(sse) * (1.0 / float(M * K))
    return recon, hidden, loss


# --------------------------- pure-JAX reference ------------------------------

def _reference(x, params, r):
    """Spec semantics: x*2-1 -> conv -> deconv -> (y+1)/2 -> MSE (f32, unfolded)."""
    B, C, H, W = x.shape
    K = C * r * r
    xs = x * 2.0 - 1.0
    xt = xs.reshape(B, C, H // r, r, W // r, r).transpose(1, 3, 5, 0, 2, 4).reshape(K, -1)
    z = params["w_enc_t"] @ xt + params["b_enc"]
    y = params["w_dec_t"] @ z + params["b_dec"]
    recon_t = (y + 1.0) * 0.5
    C_lat = z.shape[0]
    hidden = z.reshape(C_lat, B, H // r, W // r).transpose(1, 0, 2, 3)
    recon = recon_t.reshape(C, r, r, B, H // r, W // r)
    recon = jnp.transpose(recon, (3, 0, 4, 1, 5, 2)).reshape(B, C, H, W)
    loss = jnp.mean((recon - x) ** 2)
    return recon, hidden, loss


# ----------------------------------- main -------------------------------------

if __name__ == "__main__":
    # CompressorConfig(compress_ratio=4, num_channel=3, num_latent_channel=4, binary=False)
    COMPRESS_RATIO = 4
    NUM_CHANNEL = 3
    NUM_LATENT = 4
    PATCH_LEN = 2
    NUM_PATCHES = 5

    B, C, H = 2, NUM_CHANNEL, 16
    W = PATCH_LEN * H * NUM_PATCHES          # 160 -> M = 320 (exercises padding/mask)

    key = jax.random.PRNGKey(0)
    k_img, k_par = jax.random.split(key)
    img_value = jax.random.uniform(k_img, (B, C, H, W), jnp.float32)  # TGraph.value in [0,1]
    params = init_params(k_par, NUM_CHANNEL, NUM_LATENT, COMPRESS_RATIO)

    recon_ref, hidden_ref, loss_ref = _reference(img_value, params, COMPRESS_RATIO)

    # 1) f32 streaming with a deliberately small tile: exercises the multi-tile
    #    grid, per-tile SSE partials and the padded-column mask.
    fwd_f32 = jax.jit(functools.partial(
        compressor_forward, patch_len=PATCH_LEN, compress_ratio=COMPRESS_RATIO,
        tm_max=128, stream_dtype=jnp.float32))
    recon32, hidden32, loss32 = fwd_f32(img_value, params)
    jax.block_until_ready((recon32, hidden32, loss32))

    assert recon32.shape == (B, C, H, W)
    assert hidden32.shape == (B, NUM_LATENT, H // COMPRESS_RATIO, W // COMPRESS_RATIO)
    assert loss32.shape == ()
    assert jnp.allclose(recon32, recon_ref, atol=2e-3, rtol=2e-3)
    assert jnp.allclose(hidden32, hidden_ref, atol=2e-3, rtol=2e-3)
    assert jnp.allclose(loss32, loss_ref, atol=1e-3, rtol=1e-2)

    # 2) Production path: bf16 streaming, default large tiles (single tile here).
    fwd_bf16 = jax.jit(functools.partial(
        compressor_forward, patch_len=PATCH_LEN, compress_ratio=COMPRESS_RATIO))
    recon_b, hidden_b, loss_b = fwd_bf16(img_value, params)
    jax.block_until_ready((recon_b, hidden_b, loss_b))

    assert recon_b.shape == (B, C, H, W)
    assert hidden_b.shape == (B, NUM_LATENT, H // COMPRESS_RATIO, W // COMPRESS_RATIO)
    assert jnp.allclose(recon_b.astype(jnp.float32), recon_ref, atol=3e-2, rtol=3e-2)
    assert jnp.allclose(hidden_b.astype(jnp.float32), hidden_ref, atol=3e-2, rtol=3e-2)
    assert jnp.allclose(loss_b, loss_ref, atol=2e-3, rtol=5e-2)

    print("KERNEL_OK")
</pallas_src>

<mosaic_0001>
module attributes {stable_mosaic.version = 11 : i64} {
  func.func @_fused_kernel(%arg0: i32, %arg1: memref<48x128xf32, #tpu.memory_space<vmem>>, %arg2: memref<4x48xf32, #tpu.memory_space<vmem>>, %arg3: memref<4x1xf32, #tpu.memory_space<vmem>>, %arg4: memref<48x4xf32, #tpu.memory_space<vmem>>, %arg5: memref<48x1xf32, #tpu.memory_space<vmem>>, %arg6: memref<4x128xf32, #tpu.memory_space<vmem>>, %arg7: memref<48x128xf32, #tpu.memory_space<vmem>>, %arg8: memref<1x1x1xf32, #tpu.memory_space<vmem>>) attributes {dimension_semantics = [#tpu.dimension_semantics<parallel>], iteration_bounds = array<i64: 3>, scalar_prefetch = 0 : i64, scratch_operands = 0 : i64, tpu.core_type = #tpu.core_type<tc>, window_params = [{transform_indices = @transform_0, window_bounds = array<i64: 48, 128>}, {pipeline_mode = #tpu.pipeline_mode<synchronous>, transform_indices = @transform_1, window_bounds = array<i64: 4, 48>}, {pipeline_mode = #tpu.pipeline_mode<synchronous>, transform_indices = @transform_2, window_bounds = array<i64: 4, 1>}, {pipeline_mode = #tpu.pipeline_mode<synchronous>, transform_indices = @transform_3, window_bounds = array<i64: 48, 4>}, {pipeline_mode = #tpu.pipeline_mode<synchronous>, transform_indices = @transform_4, window_bounds = array<i64: 48, 1>}, {transform_indices = @transform_5, window_bounds = array<i64: 4, 128>}, {transform_indices = @transform_6, window_bounds = array<i64: 48, 128>}, {transform_indices = @transform_7, window_bounds = array<i64: 1, 1, 1>}]} {
    %c0 = arith.constant 0 : index
    %c0_0 = arith.constant 0 : index
    %0 = vector.load %arg1[%c0, %c0_0] : memref<48x128xf32, #tpu.memory_space<vmem>>, vector<48x128xf32>
    %c0_1 = arith.constant 0 : index
    %c0_2 = arith.constant 0 : index
    %1 = vector.load %arg2[%c0_1, %c0_2] : memref<4x48xf32, #tpu.memory_space<vmem>>, vector<4x48xf32>
    %cst = arith.constant dense<0.000000e+00> : vector<4x128xf32>
    %2 = tpu.matmul %1, %0, %cst {dimension_numbers = #tpu.dot_dimension_numbers<[1], [0], [0], [1], [0, 0, 1, 1], [], []>} : vector<4x48xf32>, vector<48x128xf32>, vector<4x128xf32> -> vector<4x128xf32>
    %c0_3 = arith.constant 0 : index
    %c0_4 = arith.constant 0 : index
    %3 = vector.load %arg3[%c0_3, %c0_4] : memref<4x1xf32, #tpu.memory_space<vmem>>, vector<4x1xf32>
    %4 = vector.broadcast %3 : vector<4x1xf32> to vector<4x128xf32>
    %5 = arith.addf %2, %4 : vector<4x128xf32>
    %c0_5 = arith.constant 0 : index
    %c0_6 = arith.constant 0 : index
    %6 = vector.load %arg6[%c0_5, %c0_6] : memref<4x128xf32, #tpu.memory_space<vmem>>, vector<4x128xf32>
    tpu.vector_store %arg6[%c0_5, %c0_6], %5 {strides = array<i32>} : memref<4x128xf32, #tpu.memory_space<vmem>>, vector<4x128xf32>,
    %c0_7 = arith.constant 0 : index
    %c0_8 = arith.constant 0 : index
    %7 = vector.load %arg4[%c0_7, %c0_8] : memref<48x4xf32, #tpu.memory_space<vmem>>, vector<48x4xf32>
    %cst_9 = arith.constant dense<0.000000e+00> : vector<48x128xf32>
    %8 = tpu.matmul %7, %5, %cst_9 {dimension_numbers = #tpu.dot_dimension_numbers<[1], [0], [0], [1], [0, 0, 1, 1], [], []>} : vector<48x4xf32>, vector<4x128xf32>, vector<48x128xf32> -> vector<48x128xf32>
    %c0_10 = arith.constant 0 : index
    %c0_11 = arith.constant 0 : index
    %9 = vector.load %arg5[%c0_10, %c0_11] : memref<48x1xf32, #tpu.memory_space<vmem>>, vector<48x1xf32>
    %10 = vector.broadcast %9 : vector<48x1xf32> to vector<48x128xf32>
    %11 = arith.addf %8, %10 : vector<48x128xf32>
    %c0_12 = arith.constant 0 : index
    %c0_13 = arith.constant 0 : index
    %12 = vector.load %arg7[%c0_12, %c0_13] : memref<48x128xf32, #tpu.memory_space<vmem>>, vector<48x128xf32>
    tpu.vector_store %arg7[%c0_12, %c0_13], %11 {strides = array<i32>} : memref<48x128xf32, #tpu.memory_space<vmem>>, vector<48x128xf32>,
    %13 = arith.subf %11, %0 : vector<48x128xf32>
    %14 = arith.mulf %13, %13 : vector<48x128xf32>
    %c128_i32 = arith.constant 128 : i32
    %15 = arith.muli %arg0, %c128_i32 : i32
    %16 = tpu.iota {dimensions = array<i32: 1>} : vector<1x128xi32>
    %17 = vector.broadcast %15 : i32 to vector<1x128xi32>
    %18 = arith.addi %17, %16 : vector<1x128xi32>
    %c320_i32 = arith.constant 320 : i32
    %19 = vector.broadcast %c320_i32 : i32 to vector<1x128xi32>
    %20 = arith.cmpi slt, %18, %19 : vector<1x128xi32>
    %cst_14 = arith.constant 0.000000e+00 : f32
    %21 = vector.shape_cast %20 : vector<1x128xi1> to vector<1x128xi1>
    %22 = vector.broadcast %21 : vector<1x128xi1> to vector<48x128xi1>
    %23 = vector.broadcast %cst_14 : f32 to vector<48x128xf32>
    %24 = arith.select %22, %14, %23 : vector<48x128xi1>, vector<48x128xf32>
    %cst_15 = arith.constant dense<0.000000e+00> : vector<48xf32>
    %25 = vector.multi_reduction <add>, %24, %cst_15 [1] : vector<48x128xf32> to vector<48xf32>
    %26 = vector.shape_cast %25 : vector<48xf32> to vector<48x1xf32>
    %cst_16 = arith.constant dense<0.000000e+00> : vector<1xf32>
    %27 = vector.multi_reduction <add>, %26, %cst_16 [0] : vector<48x1xf32> to vector<1xf32>
    %28 = vector.shape_cast %27 : vector<1xf32> to vector<1x1xf32>
    %29 = vector.shape_cast %28 : vector<1x1xf32> to vector<1x1x1xf32>
    %c0_17 = arith.constant 0 : index
    %c0_18 = arith.constant 0 : index
    %c0_19 = arith.constant 0 : index
    %30 = vector.load %arg8[%c0_17, %c0_18, %c0_19] : memref<1x1x1xf32, #tpu.memory_space<vmem>>, vector<1x1x1xf32>
    tpu.vector_store %arg8[%c0_17, %c0_18, %c0_19], %29 {strides = array<i32>} : memref<1x1x1xf32, #tpu.memory_space<vmem>>, vector<1x1x1xf32>,
    return
  }
  func.func @transform_0(%arg0: i32) -> (i32, i32) {
    %c0_i32 = arith.constant 0 : i32
    %c0_i32_0 = arith.constant 0 : i32
    return %c0_i32, %arg0 : i32, i32
  }
  func.func @transform_1(%arg0: i32) -> (i32, i32) {
    %c0_i32 = arith.constant 0 : i32
    %c0_i32_0 = arith.constant 0 : i32
    %c0_i32_1 = arith.constant 0 : i32
    return %c0_i32, %c0_i32_0 : i32, i32
  }
  func.func @transform_2(%arg0: i32) -> (i32, i32) {
    %c0_i32 = arith.constant 0 : i32
    %c0_i32_0 = arith.constant 0 : i32
    %c0_i32_1 = arith.constant 0 : i32
    return %c0_i32, %c0_i32_0 : i32, i32
  }
  func.func @transform_3(%arg0: i32) -> (i32, i32) {
    %c0_i32 = arith.constant 0 : i32
    %c0_i32_0 = arith.constant 0 : i32
    %c0_i32_1 = arith.constant 0 : i32
    return %c0_i32, %c0_i32_0 : i32, i32
  }
  func.func @transform_4(%arg0: i32) -> (i32, i32) {
    %c0_i32 = arith.constant 0 : i32
    %c0_i32_0 = arith.constant 0 : i32
    %c0_i32_1 = arith.constant 0 : i32
    return %c0_i32, %c0_i32_0 : i32, i32
  }
  func.func @transform_5(%arg0: i32) -> (i32, i32) {
    %c0_i32 = arith.constant 0 : i32
    %c0_i32_0 = arith.constant 0 : i32
    return %c0_i32, %arg0 : i32, i32
  }
  func.func @transform_6(%arg0: i32) -> (i32, i32) {
    %c0_i32 = arith.constant 0 : i32
    %c0_i32_0 = arith.constant 0 : i32
    return %c0_i32, %arg0 : i32, i32
  }
  func.func @transform_7(%arg0: i32) -> (i32, i32, i32) {
    %c0_i32 = arith.constant 0 : i32
    %c0_i32_0 = arith.constant 0 : i32
    %c0_i32_1 = arith.constant 0 : i32
    return %arg0, %c0_i32, %c0_i32_0 : i32, i32, i32
  }
}

</mosaic_0001>

<bundles_post_ra>
// kernel: sub.1
= control target key start
LH: loop header
LB: loop body
LE: loop exit
PB: predicated region body
PF: predicated region fallthrough
CT: control target
= control target key end

     0   :  { %s34_s0 = inlined_call_operand.vmem [shape: f32[4,1], index: 0, kind: input, shape index: {}]   ;;  %s35_s1 = inlined_call_operand.vmem [shape: f32[4,1], index: 1, kind: input, shape index: {}]   ;;  %s36_s2 = inlined_call_operand.vmem [shape: f32[4,1], index: 2, kind: output, shape index: {}]  }
   0x1   :  { %v3_v0 = vld [vmem:[%s34_s0] sm:$0xf] }
   0x2   :  { %v4_v1 = vld [vmem:[%s35_s1] sm:$0xf] }
   0x3   :  { %v7_v2 = vsub.f32 %v3_v0, %v4_v1 }
   0x5   :  { %9 = vst [vmem:[%s36_s2] sm:$0xf] %v7_v2 }

// kernel: compressor_forward.1
= control target key start
LH: loop header
LB: loop body
LE: loop exit
PB: predicated region body
PF: predicated region fallthrough
CT: control target
= control target key end

     0   :  { %s983_s24 = smov 0   ;;  %s985_s25 = smov 0   ;;  %s1144_s0 = inlined_call_operand.vmem [shape: f32[48,384], index: 0, kind: input, shape index: {}]   ;;  %s1145_s1 = inlined_call_operand.vmem [shape: f32[4,48], index: 1, kind: input, shape index: {}]   ;;  %s1146_s2 = inlined_call_operand.vmem [shape: f32[4,1], index: 2, kind: input, shape index: {}]   ;;  %s1147_s3 = inlined_call_operand.vmem [shape: f32[48,4], index: 3, kind: input, shape index: {}]   ;;  %s1148_s4 = inlined_call_operand.vmem [shape: f32[48,1], index: 4, kind: input, shape index: {}]   ;;  %s1149_s5 = inlined_call_operand.vmem [shape: f32[4,384], index: 5, kind: output, shape index: {0}]   ;;  %s1150_s6 = inlined_call_operand.vmem [shape: f32[48,384], index: 6, kind: output, shape index: {1}]   ;;  %s1151_s7 = inlined_call_operand.vmem [shape: f32[3,1,1], index: 7, kind: output, shape index: {2}]  }
   0x1   :  { %s987_s26 = smov 0  }
   0x2 LB: > { %s999_s27 = sadd.s32 4294967295, %s938_s26   ;;  %s1002_s28 = sadd.s32 1, %s938_s26   ;;  %s938_s26 = sphi %s987_s26, %s1155_s26   ;;  %s934_s25 = sphi %s985_s25, %s1154_s25   ;;  %s930_s24 = sphi %s983_s24, %s1153_s24  }
   0x3   : > { %s22_s29 = ssub.s32 %s938_s26, %s1002_s28  ;;  %s25_s30 = sadd.s32 1, %s934_s25 }
   0x4   : > { %p23_p0 = scmp.eq.s32.totalorder %s22_s29, 0  ;;  %p32_p1 = scmp.ne.s32.totalorder %s934_s25, %s930_s24 }
   0x5   : > { %p33_p2 = scmp.eq.s32.totalorder %s938_s26, 0  ;;  %p172_p3 = scmp.eq.s32.totalorder %s999_s27, 2 }
   0x6   : > { %s1012_s8 = scalar_select %p23_p0, %s934_s25, %s25_s30  }
   0x7   : > { %p34_p4 = por %p33_p2, %p32_p1  ;;  %p1014_p5 = por %p172_p3, %p32_p1 }
   0x8   : > { %p829_p6 = scmp.ge.s32.totalorder %s938_s26, 3 }
   0xa   : > { %232 = sbr.rel (%p829_p6) target bundleno = 23 (0x17), region = 32 }
   0xf   : > { %235 = sbr.rel (!%p34_p4) target bundleno = 23 (0x17), region = 36  ;;  %s237_s10 = sand.u32 (%p34_p4), 1, %s934_s25  }
  0x10   : > { %s830_s11 = sshll.u32 (%p34_p4), %s938_s26, 3  ;;  %s885_s12 = smul.u32 (%p34_p4), 48, %s237_s10 }
  0x11   : > { %s241_s15 = scalar_lea.vmem (%p34_p4), %s1144_s0, %s830_s11 }
  0x12   : > { %v280_v0 = vld [vmem:[%s241_s15] sm:$0xff] (%p34_p4)  ;;  %v282_v1 = vld [vmem:[%s241_s15 + $0x18] sm:$0xff] (%p34_p4)  ;;  %v284_v2 = vld [vmem:[%s241_s15 + $0x30] sm:$0xff] (%p34_p4)  ;;  %s239_s16 = scalar_lea.vmem (%p34_p4), [#allocation2], %s885_s12 }
  0x13   : > { %v286_v3 = vld [vmem:[%s241_s15 + $0x48] sm:$0xff] (%p34_p4)  ;;  %v288_v4 = vld [vmem:[%s241_s15 + $0x60] sm:$0xff] (%p34_p4)  ;;  %v290_v5 = vld [vmem:[%s241_s15 + $0x78] sm:$0xff] (%p34_p4)  ;;  %281 = vst [vmem:[%s239_s16] sm:$0xff] (%p34_p4), %v280_v0 }
  0x14   : > { %283 = vst [vmem:[%s239_s16 + $0x8] sm:$0xff] %v282_v1  ;;  %285 = vst [vmem:[%s239_s16 + $0x10] sm:$0xff] %v284_v2 }
  0x15   : > { %287 = vst [vmem:[%s239_s16 + $0x18] sm:$0xff] %v286_v3  ;;  %289 = vst [vmem:[%s239_s16 + $0x20] sm:$0xff] %v288_v4 }
  0x16   : > { %291 = vst [vmem:[%s239_s16 + $0x28] sm:$0xff] %v290_v5 }
  0x17 PF: > { %p831_p7 = scmp.ge.s32.totalorder %s938_s26, 1  ;;  %p296_p8 = scmp.lt.s32.totalorder %s938_s26, 4 }
  0x19   : > { %p297_p9 = pnand %p831_p7, %p296_p8 }
  0x1a   : > { %s303_s17 = sand.u32 (!%p297_p9), 1, %s930_s24   ;;  %p340_p10 = scmp.lt.s32.totalorder (!%p297_p9), %s999_s27, 2 }
  0x1b   : > { %300 = sbr.rel (%p297_p9) target bundleno = 608 (0x260), region = 74  ;;  %s841_s19 = sshll.u32 (!%p297_p9), %s999_s27, 7 }
  0x1c   : > { %s1027_s18 = smul.u32 (!%p297_p9), 48, %s303_s17 }
  0x1e   : > { %s305_s21 = scalar_lea.vmem (!%p297_p9), [#allocation2], %s1027_s18  ;;  %s1100_s20 = scalar_lea.vmem (!%p297_p9), [#allocation3], %s1027_s18 }
  0x20   : > { %v940_v6 = vmov 0.0   ;;  %vm941_vm0 = vmmov 0   ;;  %v354_v7 = vld [vmem:[%s1146_s2] sm:$0xf]  ;;  %v942_v8 = vmov 0   ;;  %v1033_v9 = vld [vmem:[%s305_s21 + $0x28] sm:$0xff]  ;;  %v614_v32 = vlaneseq }
  0x21   : > { %859 = vmatprep.subr.mxu0 %v940_v6  ;;  %871 = vmatprep.mubr.msk.f32.mxu0 %vm941_vm0, %v940_v6  ;;  %v1035_v10 = vld [vmem:[%s305_s21 + $0x20] sm:$0xff]  ;;  %v1041_v12 = vld [vmem:[%s305_s21 + $0x18] sm:$0xff]  ;;  %v1044_v13 = vld [vmem:[%s305_s21 + $0x10] sm:$0xff]  ;;  %vm360_vm1 = vcmask 392192   ;;  %vm477_vm2 = vcmask 31744   ;;  %vm496_vm3 = vcmask 1043456   ;;  %v616_v35 = vstv %s841_s19 }
  0x22   : > { %914 = vset.pattern.permute.xlu0 %v942_v8  ;;  %915 = vset.pattern.permute.xlu1 %v942_v8  ;;  %v441_v11 = vld [vmem:[%s1148_s4] sm:$0xff]  ;;  %v444_v14 = vld [vmem:[%s1148_s4 + $0x18] sm:$0xff]  ;;  %v446_v17 = vld [vmem:[%s1148_s4 + $0x28] sm:$0xff]  ;;  %v615_v34 = vand.u32 127, %v614_v32  ;;  %vm650_vm5 = vcmask 0   ;;  %s842_s24 = sshll.u32 (%p1014_p5), %s999_s27, 3 }
  0x23   : > { %357 = vperm.xlu0 %914, %v354_v7   ;;  %860 = vmatpush3.msra.mxu0 %v1033_v9  ;;  %v348_v15 = vld [vmem:[%s305_s21 + $0x8] sm:$0xff]  ;;  %v347_v16 = vld [vmem:[%s305_s21] sm:$0xff]  ;;  %s1072_s21 = scalar_select %p340_p10, %s999_s27, 2 }
  0x24   : > { %861 = vmatprep.subr.mxu0 %v940_v6  ;;  %v353_v18 = vld [vmem:[%s1145_s1] sm:$0xf]  ;;  %v442_v20 = vld [vmem:[%s1148_s4 + $0x8] sm:$0xff]  ;;  %v443_v21 = vld [vmem:[%s1148_s4 + $0x10] sm:$0xff]  ;;  %v617_v38 = vadd.s32 %v616_v35, %v615_v34 }
  0x25   : > { %862 = vmatpush3.msra.mxu0 %v1035_v10  ;;  %v435_v19 = vld [vmem:[%s1147_s3] sm:$0xff]  ;;  %454 = vperm.xlu1 %915, %v442_v20   ;;  %s832_s22 = sshll.u32 %s1072_s21, 2  ;;  %v436_v27 = vld [vmem:[%s1147_s3 + $0x8] sm:$0xff]  ;;  %v437_v28 = vld [vmem:[%s1147_s3 + $0x10] sm:$0xff]  ;;  %s346_s23 = scalar_lea.vmem %s1151_s7, %s1072_s21 }
  0x26   : > { %863 = vmatprep.subr.mxu0 %v940_v6  ;;  %876 = vmatprep.mubr.msk.f32.mxu1 %vm477_vm2, %v435_v19  ;;  %v445_v22 = vld [vmem:[%s1148_s4 + $0x20] sm:$0xff]  ;;  %s343_s26 = scalar_lea.vmem %s1149_s5, %s832_s22  ;;  %v438_v29 = vld [vmem:[%s1147_s3 + $0x18] sm:$0xff]  ;;  %v440_v31 = vld [vmem:[%s1147_s3 + $0x28] sm:$0xff]  ;;  %vm618_vm4 = vcmp.lt.s32.totalorder %v617_v38, 320  ;;  %s670_s21 = scalar_lea.vmem (%p1014_p5), %s1150_s6, %s842_s24 }
  0x27   : > { %449 = vperm.xlu0 %914, %v441_v11   ;;  %864 = vmatpush3.msra.mxu0 %v1041_v12  ;;  %v439_v30 = vld [vmem:[%s1147_s3 + $0x20] sm:$0xff] }
  0x28   : > { %865 = vmatprep.subr.mxu0 %v940_v6 }
  0x29   : > { %866 = vmatpush3.msra.mxu0 %v1044_v13  ;;  %459 = vperm.xlu1 %915, %v443_v21  }
  0x2a   : > { %867 = vmatprep.subr.mxu0 %v940_v6 }
  0x2b   : > { %464 = vperm.xlu0 %914, %v444_v14   ;;  %868 = vmatpush3.msra.mxu0 %v348_v15 }
  0x2c   : > { %869 = vmatprep.subr.mxu0 %v940_v6 }
  0x2d   : > { %870 = vmatpush3.msra.mxu0 %v347_v16  ;;  %469 = vperm.xlu1 %915, %v445_v22  }
  0x2e   : > { %872 = vmatmul.mubr.msk.f32.vlgmr.msra.gmra.mxu0 %vm360_vm1, %v353_v18 }
  0x2f   : > { %474 = vperm.xlu0 %914, %v446_v17  }
  0x9e   : > { %v358_v23 = vpop.permute.xlu0 %357 }
  0xa0   : > { %v455_v36 = vpop.permute.xlu1 %454 }
  0xa2   : > { %v450_v33 = vpop.permute.xlu0 %449 }
  0xa4   : > { %v460_v44 = vpop.permute.xlu1 %459 }
  0xa6   : > { %v465_v40 = vpop.permute.xlu0 %464 }
  0xa8   : > { %v470_v60 = vpop.permute.xlu1 %469 }
  0xaa   : > { %v475_v54 = vpop.permute.xlu0 %474 }
  0xee   : > { %v430_v24 = vpop.f32.mrf.mxu0 }
  0xef   : > { %v431_v25 = vadd.f32 %v430_v24, %v358_v23 }
  0xf0   : > { %v873_v26 = vpop.f32.mrf.mxu0 }
  0xf1   : > { %434 = vst [vmem:[%s343_s26] sm:$0xf] %v431_v25  ;;  %874 = vmatprep.subr.msk.mxu1 %vm496_vm3, %v431_v25 }
  0xf2   : > { %875 = vmatpush3.msk.msra.mxu1 %vm496_vm3, %v431_v25 }
  0xf3   : > { %877 = vmatmul.mubr.msk.f32.vlgmr.msra.gmra.mxu1 %vm477_vm2, %v436_v27 }
  0xf4   : > { %879 = vmatprep.mubr.msk.f32.mxu1 %vm477_vm2, %v437_v28 }
  0xf7   : > { %880 = vmatmul.mubr.msk.f32.gmra.mxu1 %vm477_vm2, %v438_v29 }
  0xf8   : > { %882 = vmatprep.mubr.msk.f32.mxu1 %vm477_vm2, %v439_v30 }
  0xfb   : > { %883 = vmatmul.mubr.msk.f32.gmra.mxu1 %vm477_vm2, %v440_v31 }
 0x1b3   : > { %v878_v37 = vpop.f32.mrf.mxu1 }
 0x1b4   : > { %v572_v39 = vadd.f32 %v878_v37, %v455_v36 }
 0x1b5   : > { %v566_v41 = vpop.f32.mrf.mxu1 }
 0x1b6   : > { %596 = vst [vmem:[%s1100_s20 + $0x8] sm:$0xff] %v572_v39  ;;  %v602_v42 = vsub.f32 %v572_v39, %v348_v15  ;;  %v567_v43 = vadd.f32 %v566_v41, %v450_v33 }
 0x1b7   : > { %v881_v45 = vpop.f32.mrf.mxu1 }
 0x1b8   : > { %595 = vst [vmem:[%s1100_s20] sm:$0xff] %v567_v43  ;;  %v601_v46 = vsub.f32 %v567_v43, %v347_v16  ;;  %v582_v47 = vadd.f32 %v881_v45, %v465_v40  ;;  %v608_v48 = vmul.f32 %v602_v42, %v602_v42 }
 0x1b9   : > { %v576_v49 = vpop.f32.mrf.mxu1 }
 0x1ba   : > { %598 = vst [vmem:[%s1100_s20 + $0x18] sm:$0xff] %v582_v47  ;;  %v604_v50 = vsub.f32 %v582_v47, %v1041_v12  ;;  %v577_v51 = vadd.f32 %v576_v49, %v460_v44  ;;  %v622_v52 = vsel %vm618_vm4, %v608_v48, 0.0  ;;  %v607_v53 = vmul.f32 %v601_v46, %v601_v46 }
 0x1bb   : > { %629 = vadd.xlane.f32.xlu0 %v622_v52  ;;  %v884_v55 = vpop.f32.mrf.mxu1 }
 0x1bc   : > { %597 = vst [vmem:[%s1100_s20 + $0x10] sm:$0xff] %v577_v51  ;;  %v603_v56 = vsub.f32 %v577_v51, %v1044_v13  ;;  %v592_v57 = vadd.f32 %v884_v55, %v475_v54  ;;  %v621_v58 = vsel %vm618_vm4, %v607_v53, 0.0  ;;  %v610_v59 = vmul.f32 %v604_v50, %v604_v50 }
 0x1bd   : > { %v586_v61 = vpop.f32.mrf.mxu1  ;;  %627 = vadd.xlane.f32.xlu1 %v621_v58  ;;  %v711_v26 = vld [vmem:[%s1100_s20 + $0x8] sm:$0xff] (%p1014_p5) }
 0x1be   : > { %600 = vst [vmem:[%s1100_s20 + $0x28] sm:$0xff] %v592_v57  ;;  %v606_v62 = vsub.f32 %v592_v57, %v1033_v9  ;;  %v587_v63 = vadd.f32 %v586_v61, %v470_v60  ;;  %v609_v0 = vmul.f32 %v603_v56, %v603_v56  ;;  %v624_v3 = vsel %vm618_vm4, %v610_v59, 0.0  ;;  %712 = vst [vmem:[%s670_s21 + $0x18] sm:$0xff] (%p1014_p5), %v711_v26 }
 0x1bf   : > { %v709_v25 = vld [vmem:[%s1100_s20] sm:$0xff] (%p1014_p5) }
 0x1c0   : > { %599 = vst [vmem:[%s1100_s20 + $0x20] sm:$0xff] %v587_v63  ;;  %v605_v1 = vsub.f32 %v587_v63, %v1035_v10  ;;  %v623_v2 = vsel %vm618_vm4, %v609_v0, 0.0  ;;  %v612_v4 = vmul.f32 %v606_v62, %v606_v62  ;;  %710 = vst [vmem:[%s670_s21] sm:$0xff] (%p1014_p5), %v709_v25 }
 0x1c1   : > { %631 = vadd.xlane.f32.xlu0 %v623_v2  ;;  %633 = vadd.xlane.f32.xlu1 %v624_v3  ;;  %v715_v28 = vld [vmem:[%s1100_s20 + $0x18] sm:$0xff] (%p1014_p5) }
 0x1c2   : > { %v611_v5 = vmul.f32 %v605_v1, %v605_v1  ;;  %v626_v7 = vsel %vm618_vm4, %v612_v4, 0.0  ;;  %716 = vst [vmem:[%s670_s21 + $0x48] sm:$0xff] (%p1014_p5), %v715_v28 }
 0x1c3   : > { %v713_v27 = vld [vmem:[%s1100_s20 + $0x10] sm:$0xff] (%p1014_p5) }
 0x1c4   : > { %v625_v6 = vsel %vm618_vm4, %v611_v5, 0.0  ;;  %714 = vst [vmem:[%s670_s21 + $0x30] sm:$0xff] (%p1014_p5), %v713_v27 }
 0x1c5   : > { %635 = vadd.xlane.f32.xlu0 %v625_v6  ;;  %637 = vadd.xlane.f32.xlu1 %v626_v7  ;;  %v719_v30 = vld [vmem:[%s1100_s20 + $0x28] sm:$0xff] (%p1014_p5) }
 0x1c6   : > { %720 = vst [vmem:[%s670_s21 + $0x78] sm:$0xff] (%p1014_p5), %v719_v30 }
 0x1c7   : > { %v717_v29 = vld [vmem:[%s1100_s20 + $0x20] sm:$0xff] (%p1014_p5) }
 0x1c8   : > { %718 = vst [vmem:[%s670_s21 + $0x60] sm:$0xff] (%p1014_p5), %v717_v29 }
 0x244   : > { %v630_v8 = vpop.xlane.xlu0 %629 }
 0x246   : > { %v628_v9 = vpop.xlane.xlu1 %627 }
 0x247   : > { %v639_v11 = vadd.f32 %v630_v8, %v628_v9 }
 0x24a   : > { %v632_v12 = vpop.xlane.xlu0 %631  ;;  %v634_v10 = vpop.xlane.xlu1 %633 }
 0x24b   : > { %v640_v13 = vadd.f32 %v639_v11, %v632_v12 }
 0x24d   : > { %v641_v14 = vadd.f32 %v640_v13, %v634_v10 }
 0x24e   : > { %v636_v15 = vpop.xlane.xlu0 %635  ;;  %v638_v17 = vpop.xlane.xlu1 %637 }
 0x24f   : > { %v642_v16 = vadd.f32 %v641_v14, %v636_v15 }
 0x251   : > { %v643_v18 = vadd.f32 %v642_v16, %v638_v17 }
 0x253   : > { %v644_v19 = vrot.slane %v643_v18, 4 }
 0x255   : > { %v645_v20 = vadd.f32 %v644_v19, %v643_v18 }
 0x257   : > { %v646_v21 = vrot.slane %v645_v20, 2 }
 0x259   : > { %v647_v22 = vadd.f32 %v646_v21, %v645_v20 }
 0x25b   : > { %v648_v23 = vrot.slane %v647_v22, 1  ;;  %668 = sbr.rel (!%p1014_p5) target bundleno = 608 (0x260), region = 86 }
 0x25d   : > { %v649_v24 = vadd.f32 %v648_v23, %v647_v22 }
 0x25f   : > { %651 = vst.msk [vmem:[%s346_s23] sm:$0x1] %vm650_vm5, %v649_v24 }
 0x260 PF: > { %p15_p11 = scmp.ge.s32.totalorder %s1002_s28, 5   ;;  %s1153_s24 = smov %s934_s25 }
 0x261   : > { %s1154_s25 = smov %s1012_s8  ;;  %s1155_s26 = smov %s1002_s28 }
 0x262   :  { %17 = sbr.rel (!%p15_p11) target bundleno = 2 (0x2), region = 175 }

</bundles_post_ra>
